<compile_context>
chip_gen: v6e
topology: v6e:2x2x1
jax: 0.10.0
libtpu: 0.0.40
codegen_flags: <defaults>
</compile_context>

<pallas_src>
import jax
import jax.numpy as jnp
from jax.experimental import pallas as pl
from jax.experimental.pallas import tpu as pltpu


# ---------------------------------------------------------------------------
# Kernel 1: fused QKV projection -> head-major bf16 (B, H, T, D), q pre-scaled.
# ---------------------------------------------------------------------------
def _qkv_proj_kernel(x_ref, wq_ref, bq_ref, wkv_ref, bkv_ref,
                     q_ref, k_ref, v_ref):
    """Grid step == (batch b, token-tile ti).  One projection per token, total."""
    _, H, t, D = q_ref.shape
    E = H * D

    x = x_ref[0]                                                      # (t, E) bf16
    q = jnp.dot(x, wq_ref[...], preferred_element_type=jnp.float32) + bq_ref[...]
    kv = jnp.dot(x, wkv_ref[...], preferred_element_type=jnp.float32) + bkv_ref[...]

    # Single reshape+transpose to head-major layout, done once per token tile.
    q_ref[0] = jnp.swapaxes(q.reshape(t, H, D), 0, 1).astype(q_ref.dtype)
    k_ref[0] = jnp.swapaxes(kv[:, :E].reshape(t, H, D), 0, 1).astype(k_ref.dtype)
    v_ref[0] = jnp.swapaxes(kv[:, E:].reshape(t, H, D), 0, 1).astype(v_ref.dtype)


def _qkv_projection(x_bf, w_q, b_q, w_kv, b_kv, *, num_heads, head_dim,
                    proj_block=256):
    bsz, tgt_len, E = x_bf.shape
    tp = min(proj_block, tgt_len)
    # TODO(synk): pad ragged sequence lengths instead of asserting divisibility.
    assert tgt_len % tp == 0
    n_t = tgt_len // tp

    hm_shape = jax.ShapeDtypeStruct((bsz, num_heads, tgt_len, head_dim), jnp.bfloat16)
    hm_spec = pl.BlockSpec((1, num_heads, tp, head_dim), lambda b, ti: (b, 0, ti, 0))

    return pl.pallas_call(
        _qkv_proj_kernel,
        out_shape=(hm_shape, hm_shape, hm_shape),
        grid_spec=pltpu.PrefetchScalarGridSpec(
            num_scalar_prefetch=0,
            grid=(bsz, n_t),
            in_specs=[
                pl.BlockSpec((1, tp, E), lambda b, ti: (b, ti, 0)),    # x tile (bf16)
                pl.BlockSpec((E, E), lambda b, ti: (0, 0)),            # w_q (scaled)
                pl.BlockSpec((1, E), lambda b, ti: (0, 0)),            # b_q (scaled)
                pl.BlockSpec((E, 2 * E), lambda b, ti: (0, 0)),        # w_kv
                pl.BlockSpec((1, 2 * E), lambda b, ti: (0, 0)),        # b_kv
            ],
            out_specs=(hm_spec, hm_spec, hm_spec),
        ),
        compiler_params=pltpu.CompilerParams(
            dimension_semantics=("parallel", "parallel")),
    )(x_bf, w_q, b_q, w_kv, b_kv)


# ---------------------------------------------------------------------------
# Kernel 2: flash attention over pre-projected head-major q/k/v + fused out_proj.
# ---------------------------------------------------------------------------
def _flash_attn_kernel(q_ref, k_ref, v_ref, wo_ref, bo_ref, o_ref,
                       m_sc, l_sc, acc_sc):
    """Grid step == (batch b, q-tile qi, kv-tile ki); online softmax over ki."""
    ki = pl.program_id(2)

    @pl.when(ki == 0)
    def _init():
        m_sc[...] = jnp.full(m_sc.shape, -jnp.inf, jnp.float32)
        l_sc[...] = jnp.zeros(l_sc.shape, jnp.float32)
        acc_sc[...] = jnp.zeros(acc_sc.shape, jnp.float32)

    q = q_ref[0]                                                      # (H, tq, D) bf16
    k = k_ref[0]                                                      # (H, tk, D) bf16
    v = v_ref[0]                                                      # (H, tk, D) bf16

    # Batched scores; the K "transpose" is absorbed into the contraction dims.
    s = jnp.einsum("hqd,hkd->hqk", q, k,
                   preferred_element_type=jnp.float32)                # (H, tq, tk) f32

    # Online softmax update (all f32).
    m_prev = m_sc[...]                                                # (H, tq, 1)
    m_new = jnp.maximum(m_prev, jnp.max(s, axis=-1, keepdims=True))
    alpha = jnp.exp(m_prev - m_new)
    p = jnp.exp(s - m_new)                                            # (H, tq, tk)
    l_sc[...] = alpha * l_sc[...] + jnp.sum(p, axis=-1, keepdims=True)
    acc_sc[...] = alpha * acc_sc[...] + jnp.einsum(
        "hqk,hkd->hqd", p.astype(jnp.bfloat16), v,
        preferred_element_type=jnp.float32)                           # (H, tq, D)
    m_sc[...] = m_new

    @pl.when(ki == pl.num_programs(2) - 1)
    def _finalize():
        H, tq, D = acc_sc.shape
        E = H * D
        # Normalize once on the (H, tq, D) accumulator (EUP reciprocal slot).
        o = acc_sc[...] * pl.reciprocal(l_sc[...], approx=True)       # (H, tq, D) f32
        # One full-E out_proj matmul (fills the MXU K dim), no per-head loop/sum.
        o_flat = jnp.swapaxes(o, 0, 1).reshape(tq, E).astype(jnp.bfloat16)   # (tq, E)
        out = jnp.dot(o_flat, wo_ref[...],
                      preferred_element_type=jnp.float32) + bo_ref[...]      # (tq, E)
        o_ref[0] = out.astype(o_ref.dtype)


def _attn_vmem_bytes(H, D, E, tq, tk, out_itemsize):
    """Rough per-call VMEM footprint of the attention kernel (padded layouts)."""
    def rnd(n, m):
        return ((n + m - 1) // m) * m
    bf16, f32 = 2, 4
    q_tile = H * rnd(tq, 16) * rnd(D, 128) * bf16
    kv_tile = H * rnd(tk, 16) * rnd(D, 128) * bf16
    w_o = rnd(E, 16) * rnd(E, 128) * bf16
    b_o = rnd(1, 8) * rnd(E, 128) * f32
    out_tile = rnd(tq, 8) * rnd(E, 128) * out_itemsize
    pipelined = 2 * (q_tile + 2 * kv_tile + w_o + b_o + out_tile)     # double-buffered
    scratch = 2 * H * rnd(tq, 8) * 128 * f32 + H * rnd(tq, 8) * rnd(D, 128) * f32
    temps = 3 * H * rnd(tq, 8) * rnd(tk, 128) * f32                   # s / p live copies
    return pipelined + scratch + temps


def self_multihead_attention(x, w_in, b_in, w_out, b_out, *, num_heads,
                             scaling_factor=1.0, q_block=128, kv_block=128,
                             proj_block=256, vmem_limit_bytes=None):
    """Pallas implementation of SelfMultiheadAttention.forward (eval, no mask)."""
    bsz, tgt_len, embed_dim = x.shape
    H = num_heads
    D = embed_dim // num_heads
    assert D * H == embed_dim, "embed_dim must be divisible by num_heads"
    E = embed_dim
    scaling = float((D * scaling_factor) ** (-0.5))

    # Host-side weight prep: fold q-scaling in f32, split q vs kv, cast matmul
    # operands to bf16 (biases stay f32; they are added post-accumulation).
    w_q = (w_in[:, :E].astype(jnp.float32) * scaling).astype(jnp.bfloat16)    # (E, E)
    b_q = (b_in[:E].astype(jnp.float32) * scaling).reshape(1, E)              # (1, E)
    w_kv = w_in[:, E:].astype(jnp.bfloat16)                                   # (E, 2E)
    b_kv = b_in[E:].astype(jnp.float32).reshape(1, 2 * E)                     # (1, 2E)
    w_o = w_out.astype(jnp.bfloat16)                                          # (E, E)
    b_o = b_out.astype(jnp.float32).reshape(1, E)                             # (1, E)

    # Cast activations once on host: halves HBM<->VMEM DMA for x tiles.
    x_bf = x.astype(jnp.bfloat16)

    # Pass 1: QKV projection, once per token (NOT once per q-tile).
    q, k, v = _qkv_projection(x_bf, w_q, b_q, w_kv, b_kv,
                              num_heads=H, head_dim=D, proj_block=proj_block)

    tq = min(q_block, tgt_len)
    tk = min(kv_block, tgt_len)
    # TODO(synk): pad ragged sequence lengths instead of asserting divisibility.
    assert tgt_len % tq == 0 and tgt_len % tk == 0
    n_q = tgt_len // tq
    n_kv = tgt_len // tk

    if vmem_limit_bytes is None:
        est = _attn_vmem_bytes(H, D, E, tq, tk, jnp.dtype(x.dtype).itemsize)
        # Leave headroom for compiler internals; never request v7x's full 64 MiB.
        vmem_limit_bytes = int(min(max(est * 5 // 4, 32 * 1024 * 1024),
                                   56 * 1024 * 1024))

    # Pass 2: flash attention + fused out_proj.
    return pl.pallas_call(
        _flash_attn_kernel,
        out_shape=jax.ShapeDtypeStruct((bsz, tgt_len, E), x.dtype),
        grid_spec=pltpu.PrefetchScalarGridSpec(
            num_scalar_prefetch=0,
            grid=(bsz, n_q, n_kv),
            in_specs=[
                pl.BlockSpec((1, H, tq, D), lambda b, qi, ki: (b, 0, qi, 0)),  # q tile
                pl.BlockSpec((1, H, tk, D), lambda b, qi, ki: (b, 0, ki, 0)),  # k tile
                pl.BlockSpec((1, H, tk, D), lambda b, qi, ki: (b, 0, ki, 0)),  # v tile
                pl.BlockSpec((E, E), lambda b, qi, ki: (0, 0)),                # w_out
                pl.BlockSpec((1, E), lambda b, qi, ki: (0, 0)),                # b_out
            ],
            out_specs=pl.BlockSpec((1, tq, E), lambda b, qi, ki: (b, qi, 0)),
            scratch_shapes=[
                pltpu.VMEM((H, tq, 1), jnp.float32),                  # running max m
                pltpu.VMEM((H, tq, 1), jnp.float32),                  # running sum l
                pltpu.VMEM((H, tq, D), jnp.float32),                  # PV accumulator
            ],
        ),
        compiler_params=pltpu.CompilerParams(
            dimension_semantics=("parallel", "parallel", "arbitrary"),
            vmem_limit_bytes=vmem_limit_bytes),
    )(q, k, v, w_o, b_o)


# ---------------------------------------------------------------------------
# Pure-JAX (f32) replica of the PyTorch forward (eval, no mask/bias).
# ---------------------------------------------------------------------------
def _reference(x, w_in, b_in, w_out, b_out, *, num_heads, scaling_factor=1.0):
    bsz, tgt_len, embed_dim = x.shape
    head_dim = embed_dim // num_heads
    scaling = (head_dim * scaling_factor) ** (-0.5)

    qkv = x @ w_in + b_in                                             # (B, T, 3E)
    q, k, v = jnp.split(qkv, 3, axis=-1)

    def to_heads(t):
        return t.reshape(bsz, tgt_len, num_heads, head_dim).transpose(0, 2, 1, 3)

    q = to_heads(q) * scaling
    k = to_heads(k)
    v = to_heads(v)

    attn_weights = jnp.einsum("bhqd,bhkd->bhqk", q, k)
    attn = jax.nn.softmax(attn_weights, axis=-1)
    o = jnp.einsum("bhqk,bhkd->bhqd", attn, v)
    o = o.transpose(0, 2, 1, 3).reshape(bsz, tgt_len, embed_dim)
    return o @ w_out + b_out


if __name__ == "__main__":
    # Small shapes consistent with the module: B=2, T=8, embed_dim=32, heads=4.
    bsz, tgt_len, embed_dim, num_heads = 2, 8, 32, 4

    key = jax.random.PRNGKey(0)
    kx, k1, k2, k3, k4 = jax.random.split(key, 5)

    x = jax.random.normal(kx, (bsz, tgt_len, embed_dim), dtype=jnp.float32)

    # Deterministic parameter init (stand-in for nn.Linear params).
    w_in = jax.random.normal(k1, (embed_dim, 3 * embed_dim), jnp.float32) * 0.1
    b_in = jax.random.normal(k2, (3 * embed_dim,), jnp.float32) * 0.1
    w_out = jax.random.normal(k3, (embed_dim, embed_dim), jnp.float32) * 0.1
    b_out = jax.random.normal(k4, (embed_dim,), jnp.float32) * 0.1

    out = self_multihead_attention(x, w_in, b_in, w_out, b_out,
                                   num_heads=num_heads)
    out = jax.block_until_ready(out)

    ref = _reference(x, w_in, b_in, w_out, b_out, num_heads=num_heads)

    assert out.shape == (bsz, tgt_len, embed_dim)
    assert bool(jnp.all(jnp.isfinite(out))), "non-finite values in kernel output"
    # Tolerance accounts for bf16 MXU operands / bf16 q,k,v intermediates (f32
    # accumulation) and the approx reciprocal in softmax; reference is full f32.
    assert jnp.allclose(out, ref, atol=5e-2, rtol=5e-2), "mismatch vs reference"

    print("KERNEL_OK")
</pallas_src>

<mosaic_0001>
module attributes {stable_mosaic.version = 11 : i64} {
  func.func @_qkv_proj_kernel(%arg0: i32, %arg1: i32, %arg2: memref<1x8x32xbf16, #tpu.memory_space<vmem>>, %arg3: memref<32x32xbf16, #tpu.memory_space<vmem>>, %arg4: memref<1x32xf32, #tpu.memory_space<vmem>>, %arg5: memref<32x64xbf16, #tpu.memory_space<vmem>>, %arg6: memref<1x64xf32, #tpu.memory_space<vmem>>, %arg7: memref<1x4x8x8xbf16, #tpu.memory_space<vmem>>, %arg8: memref<1x4x8x8xbf16, #tpu.memory_space<vmem>>, %arg9: memref<1x4x8x8xbf16, #tpu.memory_space<vmem>>) attributes {dimension_semantics = [#tpu.dimension_semantics<parallel>, #tpu.dimension_semantics<parallel>], iteration_bounds = array<i64: 2, 1>, scalar_prefetch = 0 : i64, scratch_operands = 0 : i64, tpu.core_type = #tpu.core_type<tc>, window_params = [{transform_indices = @transform_0, window_bounds = array<i64: 1, 8, 32>}, {pipeline_mode = #tpu.pipeline_mode<synchronous>, transform_indices = @transform_1, window_bounds = array<i64: 32, 32>}, {pipeline_mode = #tpu.pipeline_mode<synchronous>, transform_indices = @transform_2, window_bounds = array<i64: 1, 32>}, {pipeline_mode = #tpu.pipeline_mode<synchronous>, transform_indices = @transform_3, window_bounds = array<i64: 32, 64>}, {pipeline_mode = #tpu.pipeline_mode<synchronous>, transform_indices = @transform_4, window_bounds = array<i64: 1, 64>}, {transform_indices = @transform_5, window_bounds = array<i64: 1, 4, 8, 8>}, {transform_indices = @transform_6, window_bounds = array<i64: 1, 4, 8, 8>}, {transform_indices = @transform_7, window_bounds = array<i64: 1, 4, 8, 8>}]} {
    %c0 = arith.constant 0 : index
    %c0_0 = arith.constant 0 : index
    %c0_1 = arith.constant 0 : index
    %0 = vector.load %arg2[%c0, %c0_0, %c0_1] : memref<1x8x32xbf16, #tpu.memory_space<vmem>>, vector<1x8x32xbf16>
    %1 = vector.shape_cast %0 : vector<1x8x32xbf16> to vector<8x32xbf16>
    %c0_2 = arith.constant 0 : index
    %c0_3 = arith.constant 0 : index
    %2 = vector.load %arg3[%c0_2, %c0_3] : memref<32x32xbf16, #tpu.memory_space<vmem>>, vector<32x32xbf16>
    %cst = arith.constant dense<0.000000e+00> : vector<8x32xf32>
    %3 = tpu.matmul %1, %2, %cst {dimension_numbers = #tpu.dot_dimension_numbers<[1], [0], [0], [1], [0, 0, 1, 1], [], []>} : vector<8x32xbf16>, vector<32x32xbf16>, vector<8x32xf32> -> vector<8x32xf32>
    %c0_4 = arith.constant 0 : index
    %c0_5 = arith.constant 0 : index
    %4 = vector.load %arg4[%c0_4, %c0_5] : memref<1x32xf32, #tpu.memory_space<vmem>>, vector<1x32xf32>
    %5 = vector.broadcast %4 : vector<1x32xf32> to vector<8x32xf32>
    %6 = arith.addf %3, %5 : vector<8x32xf32>
    %c0_6 = arith.constant 0 : index
    %c0_7 = arith.constant 0 : index
    %7 = vector.load %arg5[%c0_6, %c0_7] : memref<32x64xbf16, #tpu.memory_space<vmem>>, vector<32x64xbf16>
    %cst_8 = arith.constant dense<0.000000e+00> : vector<8x64xf32>
    %8 = tpu.matmul %1, %7, %cst_8 {dimension_numbers = #tpu.dot_dimension_numbers<[1], [0], [0], [1], [0, 0, 1, 1], [], []>} : vector<8x32xbf16>, vector<32x64xbf16>, vector<8x64xf32> -> vector<8x64xf32>
    %c0_9 = arith.constant 0 : index
    %c0_10 = arith.constant 0 : index
    %9 = vector.load %arg6[%c0_9, %c0_10] : memref<1x64xf32, #tpu.memory_space<vmem>>, vector<1x64xf32>
    %10 = vector.broadcast %9 : vector<1x64xf32> to vector<8x64xf32>
    %11 = arith.addf %8, %10 : vector<8x64xf32>
    %12 = vector.shape_cast %6 : vector<8x32xf32> to vector<8x4x8xf32>
    %13 = tpu.transpose %12, [1, 0, 2] : vector<8x4x8xf32> -> vector<4x8x8xf32>
    %14 = arith.truncf %13 : vector<4x8x8xf32> to vector<4x8x8xbf16>
    %c0_11 = arith.constant 0 : index
    %c0_12 = arith.constant 0 : index
    %c0_13 = arith.constant 0 : index
    %c0_14 = arith.constant 0 : index
    %15 = vector.load %arg7[%c0_11, %c0_12, %c0_13, %c0_14] : memref<1x4x8x8xbf16, #tpu.memory_space<vmem>>, vector<1x4x8x8xbf16>
    %16 = vector.shape_cast %15 : vector<1x4x8x8xbf16> to vector<4x8x8xbf16>
    %17 = vector.shape_cast %14 : vector<4x8x8xbf16> to vector<1x4x8x8xbf16>
    tpu.vector_store %arg7[%c0_11, %c0_12, %c0_13, %c0_14], %17 {strides = array<i32>} : memref<1x4x8x8xbf16, #tpu.memory_space<vmem>>, vector<1x4x8x8xbf16>,
    %18 = vector.extract_strided_slice %11 {offsets = [0, 0], sizes = [8, 32], strides = [1, 1]} : vector<8x64xf32> to vector<8x32xf32>
    %19 = vector.shape_cast %18 : vector<8x32xf32> to vector<8x4x8xf32>
    %20 = tpu.transpose %19, [1, 0, 2] : vector<8x4x8xf32> -> vector<4x8x8xf32>
    %21 = arith.truncf %20 : vector<4x8x8xf32> to vector<4x8x8xbf16>
    %c0_15 = arith.constant 0 : index
    %c0_16 = arith.constant 0 : index
    %c0_17 = arith.constant 0 : index
    %c0_18 = arith.constant 0 : index
    %22 = vector.load %arg8[%c0_15, %c0_16, %c0_17, %c0_18] : memref<1x4x8x8xbf16, #tpu.memory_space<vmem>>, vector<1x4x8x8xbf16>
    %23 = vector.shape_cast %22 : vector<1x4x8x8xbf16> to vector<4x8x8xbf16>
    %24 = vector.shape_cast %21 : vector<4x8x8xbf16> to vector<1x4x8x8xbf16>
    tpu.vector_store %arg8[%c0_15, %c0_16, %c0_17, %c0_18], %24 {strides = array<i32>} : memref<1x4x8x8xbf16, #tpu.memory_space<vmem>>, vector<1x4x8x8xbf16>,
    %25 = vector.extract_strided_slice %11 {offsets = [0, 32], sizes = [8, 32], strides = [1, 1]} : vector<8x64xf32> to vector<8x32xf32>
    %26 = vector.shape_cast %25 : vector<8x32xf32> to vector<8x4x8xf32>
    %27 = tpu.transpose %26, [1, 0, 2] : vector<8x4x8xf32> -> vector<4x8x8xf32>
    %28 = arith.truncf %27 : vector<4x8x8xf32> to vector<4x8x8xbf16>
    %c0_19 = arith.constant 0 : index
    %c0_20 = arith.constant 0 : index
    %c0_21 = arith.constant 0 : index
    %c0_22 = arith.constant 0 : index
    %29 = vector.load %arg9[%c0_19, %c0_20, %c0_21, %c0_22] : memref<1x4x8x8xbf16, #tpu.memory_space<vmem>>, vector<1x4x8x8xbf16>
    %30 = vector.shape_cast %29 : vector<1x4x8x8xbf16> to vector<4x8x8xbf16>
    %31 = vector.shape_cast %28 : vector<4x8x8xbf16> to vector<1x4x8x8xbf16>
    tpu.vector_store %arg9[%c0_19, %c0_20, %c0_21, %c0_22], %31 {strides = array<i32>} : memref<1x4x8x8xbf16, #tpu.memory_space<vmem>>, vector<1x4x8x8xbf16>,
    return
  }
  func.func @transform_0(%arg0: i32, %arg1: i32) -> (i32, i32, i32) {
    %c0_i32 = arith.constant 0 : i32
    %c0_i32_0 = arith.constant 0 : i32
    return %arg0, %arg1, %c0_i32 : i32, i32, i32
  }
  func.func @transform_1(%arg0: i32, %arg1: i32) -> (i32, i32) {
    %c0_i32 = arith.constant 0 : i32
    %c0_i32_0 = arith.constant 0 : i32
    %c0_i32_1 = arith.constant 0 : i32
    return %c0_i32, %c0_i32_0 : i32, i32
  }
  func.func @transform_2(%arg0: i32, %arg1: i32) -> (i32, i32) {
    %c0_i32 = arith.constant 0 : i32
    %c0_i32_0 = arith.constant 0 : i32
    %c0_i32_1 = arith.constant 0 : i32
    return %c0_i32, %c0_i32_0 : i32, i32
  }
  func.func @transform_3(%arg0: i32, %arg1: i32) -> (i32, i32) {
    %c0_i32 = arith.constant 0 : i32
    %c0_i32_0 = arith.constant 0 : i32
    %c0_i32_1 = arith.constant 0 : i32
    return %c0_i32, %c0_i32_0 : i32, i32
  }
  func.func @transform_4(%arg0: i32, %arg1: i32) -> (i32, i32) {
    %c0_i32 = arith.constant 0 : i32
    %c0_i32_0 = arith.constant 0 : i32
    %c0_i32_1 = arith.constant 0 : i32
    return %c0_i32, %c0_i32_0 : i32, i32
  }
  func.func @transform_5(%arg0: i32, %arg1: i32) -> (i32, i32, i32, i32) {
    %c0_i32 = arith.constant 0 : i32
    %c0_i32_0 = arith.constant 0 : i32
    %c0_i32_1 = arith.constant 0 : i32
    return %arg0, %c0_i32, %arg1, %c0_i32_0 : i32, i32, i32, i32
  }
  func.func @transform_6(%arg0: i32, %arg1: i32) -> (i32, i32, i32, i32) {
    %c0_i32 = arith.constant 0 : i32
    %c0_i32_0 = arith.constant 0 : i32
    %c0_i32_1 = arith.constant 0 : i32
    return %arg0, %c0_i32, %arg1, %c0_i32_0 : i32, i32, i32, i32
  }
  func.func @transform_7(%arg0: i32, %arg1: i32) -> (i32, i32, i32, i32) {
    %c0_i32 = arith.constant 0 : i32
    %c0_i32_0 = arith.constant 0 : i32
    %c0_i32_1 = arith.constant 0 : i32
    return %arg0, %c0_i32, %arg1, %c0_i32_0 : i32, i32, i32, i32
  }
}

</mosaic_0001>

<bundles_post_ra>
// kernel: tpu_custom_call.1
= control target key start
LH: loop header
LB: loop body
LE: loop exit
PB: predicated region body
PF: predicated region fallthrough
CT: control target
= control target key end

     0   :  { %s1986_s0 = inlined_call_operand.hbm [shape: bf16[2,8,32], index: 0, kind: input, shape index: {}]   ;;  %s1987_s1 = inlined_call_operand.hbm [shape: bf16[32,32], index: 1, kind: input, shape index: {}]   ;;  %s1988_s2 = inlined_call_operand.vmem [shape: f32[1,32], index: 2, kind: input, shape index: {}]   ;;  %s1989_s3 = inlined_call_operand.hbm [shape: bf16[32,64], index: 3, kind: input, shape index: {}]   ;;  %s1990_s4 = inlined_call_operand.vmem [shape: f32[1,64], index: 4, kind: input, shape index: {}]   ;;  %s1991_s5 = inlined_call_operand.hbm [shape: bf16[2,4,8,8], index: 5, kind: output, shape index: {0}]   ;;  %s1992_s6 = inlined_call_operand.hbm [shape: bf16[2,4,8,8], index: 6, kind: output, shape index: {1}]   ;;  %s1993_s7 = inlined_call_operand.hbm [shape: bf16[2,4,8,8], index: 7, kind: output, shape index: {2}]  }
   0x1   :  { %1997 = sst [smem:[#allocation17_spill]] %s1987_s1 }
   0x2   :  { %1998 = sst [smem:[#allocation18_spill]] %s1989_s3 }
   0x3   :  { %13 = vsyncpa [#allocation3], 0 }
   0x4   :  { %15 = vsyncpa [#allocation3 + $0x1], 0 }
   0x5   :  { %16 = vsyncpa [#allocation6], 0 }
   0x6   :  { %17 = vsyncpa [#allocation4], 0 }
   0x7   :  { %19 = vsyncpa [#allocation4 + $0x1], 0 }
   0x8   :  { %20 = vsyncpa [#allocation10], 0 }
   0x9   :  { %22 = vsyncpa [#allocation10 + $0x1], 0  ;;  %s1640_s24 = smov 0   ;;  %s1642_s25 = smov 0  }
   0xa   :  { %s1644_s26 = smov 0   ;;  %s1646_s27 = smov 0  }
   0xb   :  { %s1648_s28 = smov 0   ;;  %s1650_s29 = smov 0  }
   0xc LB: > { %s1671_s30 = sadd.s32 4294967295, %s1580_s29   ;;  %s1995_s8 = sadd.s32 4294967294, %s1580_s29   ;;  %s1580_s29 = sphi %s1650_s29, %s28_s29   ;;  %s1576_s28 = sphi %s1648_s28, %s2019_s28   ;;  %s1572_s27 = sphi %s1646_s27, %s2018_s27   ;;  %s1568_s26 = sphi %s1644_s26, %s2017_s26   ;;  %s1564_s25 = sphi %s1642_s25, %s2016_s25   ;;  %s1560_s24 = sphi %s1640_s24, %s2015_s24  }
   0xd   : > { %p62_p0 = scmp.ne.s32.totalorder %s1564_s25, %s1560_s24  ;;  %p1994_p1 = scmp.eq.s32.totalorder %s1671_s30, 0 }
   0xe   : > { %p178_p3 = scmp.eq.s32.totalorder %s1995_s8, 1  ;;  %p1188_p5 = scmp.ge.s32.totalorder %s1580_s29, 1 }
   0xf   : > { %p1682_p4 = por %p1994_p1, %p62_p0  ;;  %p241_p7 = scmp.lt.s32.totalorder %s1580_s29, 3 }
  0x10   : > { %p1687_p6 = por %p178_p3, %p62_p0  ;;  %s1582_s12 = smov [#allocation5]  }
  0x11   : > { %p1692_p8 = pnand %p1188_p5, %p241_p7  ;;  %s253_s13 = sshll.u32 %s1582_s12, 4  ;;  %s254_s13 = int_to_ptr.vmem [resolvable:$true] %s253_s13 }
  0x12   : > { %s2000_s10 = scalar_select %p1687_p6, 1, 0 }
  0x13   : > { %p1267_p9 = pneg %p1692_p8  ;;  %s1583_s15 = smov [#allocation7]  }
  0x14   : > { %s269_s16 = sshll.u32 %s1583_s15, 4  ;;  %s1371_s17 = scalar_lea.vmem %s254_s13, 256  ;;  %s270_s16 = int_to_ptr.vmem [resolvable:$true] %s269_s16 }
  0x15   : > { %p1701_p11 = pnand %p1267_p9, %p1994_p1  ;;  %p1372_p13 = scmp.ne.s32.totalorder %s254_s13, %s1371_s17 }
  0x16   : > { %p1379_p5 = scmp.lt.s32.totalorder %s254_s13, %s254_s13  ;;  %p1380_p7 = scmp.lt.s32.totalorder %s1371_s17, %s1371_s17 }
  0x17   : > { %p1362_p12 = pneg %p1701_p11 }
  0x18   : > { %p1381_p10 = por %p1380_p7, %p1379_p5 }
  0x19   : > { %p1374_p0 = pnand %p1372_p13, %p1362_p12 }
  0x1b   : > { %p1375_p3 = pneg %p1374_p0 }
  0x1d   : > { %p1382_p9 = pnand %p1381_p10, %p1375_p3 }
  0x1f   : > { %1385 = shalt.err (!%p1382_p9)
}
  0x20   : > { %s1584_s18 = smov 64   ;;  %s1585_s19 = smov 4  }
  0x21   : > { %s2003_s1 = sld [smem:[#allocation17_spill]]  ;;  %s1397_s22 = scalar_lea.vmem %s270_s16, 256 }
  0x22   : > { %p1398_p1 = scmp.ne.s32.totalorder %s270_s16, %s1397_s22  ;;  %p1405_p2 = scmp.lt.s32.totalorder %s270_s16, %s270_s16 }
  0x23   : > { %p1406_p6 = scmp.lt.s32.totalorder %s1397_s22, %s1397_s22 }
  0x24   : > { %p1400_p13 = pnand %p1398_p1, %p1362_p12 }
  0x25   : > { %p1407_p5 = por %p1406_p6, %p1405_p2 }
  0x26   : > { %p1401_p0 = pneg %p1400_p13 }
  0x27   : > { %1270 = dma.hbm_to_vmem [thread:$0]  (!%p1701_p11), %s2003_s1, 256, %s254_s13, [#allocation6], %s1584_s18, %s1584_s18, %s1585_s19  }
  0x28   : > { %p1408_p10 = pnand %p1407_p5, %p1401_p0 }
  0x2a   : > { %1411 = shalt.err (!%p1408_p10)
}
  0x2b   : > { %s2004_s3 = sld [smem:[#allocation18_spill]]  ;;  %s40_s13 = sadd.s32 1, %s1576_s28 }
  0x2c   : > { %s49_s15 = sadd.s32 1, %s1568_s26  ;;  %p42_p1 = scmp.ge.s32.totalorder %s40_s13, 2 }
  0x2d   : > { %p56_p2 = scmp.ne.s32.totalorder %s1568_s26, %s1564_s25  ;;  %p57_p6 = scmp.eq.s32.totalorder %s1580_s29, 0 }
  0x2e   : > { %p1290_p12 = scmp.lt.s32.totalorder %s1580_s29, 2  ;;  %s2021_s13 = smov (%p42_p1, %s40_s13), 0 }
  0x2f   : > { %2005 = sst [smem:[#allocation16_spill]] %s2021_s13  ;;  %p58_p3 = por %p57_p6, %p56_p2 }
  0x30   : > { %p2006_p7 = scmp.eq.s32.totalorder %s1671_s30, 1  ;;  %s44_s17 = ssub.s32 %s1576_s28, %s2021_s13 }
  0x31   : > { %1273 = dma.hbm_to_vmem [thread:$0]  (!%p1701_p11), %s2004_s3, 256, %s270_s16, [#allocation6], %s1584_s18, %s1584_s18, %s1585_s19  }
  0x32   : > { %p1733_p9 = por %p2006_p7, %p56_p2  ;;  %s286_s20 = sand.u32 1, %s1568_s26  }
  0x33   : > { %p47_p13 = scmp.eq.s32.totalorder %s44_s17, 0  ;;  %s1192_s16 = sshll.u32 %s286_s20, 2 }
  0x34   : > { %s1193_s18 = sshll.u32 %s1576_s28, 6  ;;  %s290_s12 = scalar_lea.vmem [#allocation2], %s1192_s16 }
  0x35   : > { %s1742_s19 = scalar_select %p47_p13, %s1568_s26, %s49_s15  }
  0x36   : > { %s296_s23 = scalar_lea.hbm %s1986_s0, %s1193_s18  ;;  %s298_s8 = sshll.u32 %s290_s12, 4  ;;  %s299_s8 = int_to_ptr.vmem [resolvable:$true] %s298_s8 }
  0x37   : > { %p1749_p11 = pnand %p1290_p12, %p58_p3  ;;  %s287_s3 = scalar_lea.sflag [#allocation3], %s286_s20 }
  0x38   : > { %s1425_s17 = scalar_lea.vmem %s299_s8, 64  ;;  %s1586_s15 = smov [#allocation2]  }
  0x39   : > { %p1414_p0 = pneg %p1749_p11  ;;  %p1426_p5 = scmp.ne.s32.totalorder %s299_s8, %s1425_s17 }
  0x3a   : > { %s1430_s13 = sshll.u32 %s1586_s15, 4  ;;  %s1431_s13 = int_to_ptr.vmem [resolvable:$false] %s1430_s13 }
  0x3b   : > { %p1428_p10 = pnand %p1426_p5, %p1414_p0  ;;  %s1432_s18 = scalar_lea.vmem %s1431_s13, 128 }
  0x3c   : > { %p1433_p2 = scmp.lt.s32.totalorder %s299_s8, %s1431_s13  ;;  %p1434_p6 = scmp.lt.s32.totalorder %s1432_s18, %s1425_s17 }
  0x3d   : > { %p1429_p1 = pneg %p1428_p10 }
  0x3e   : > { %p1435_p7 = por %p1434_p6, %p1433_p2 }
  0x40   : > { %p1436_p12 = pnand %p1435_p7, %p1429_p1 }
  0x42   : > { %1439 = shalt.err (!%p1436_p12)
}
  0x43   : > { %1277 = dma.hbm_to_vmem [thread:$0]  (!%p1749_p11), %s296_s23, 64, %s299_s8, %s287_s3  }
  0x44   : > { %307 = sbr.rel (%p1692_p8) target bundleno = 550 (0x226), region = 40  ;;  %s1760_s20 = sand.u32 (!%p1692_p8), 1, %s1564_s25  }
  0x45   : > { %s1195_s16 = sshll.u32 (!%p1692_p8), %s1760_s20, 2  ;;  %s310_s21 = scalar_lea.sflag (!%p1692_p8), [#allocation3], %s1760_s20 }
  0x46   : > { %s313_s22 = scalar_lea.vmem (!%p1692_p8), [#allocation2], %s1195_s16 }
  0x49   : > { %1543 = dma.done.wait (%p1682_p4), %s310_s21, 64  }
  0x4a   : > { %1545 = vsyncadd (%p1682_p4), %s310_s21, 4294967232  ;;  %p2009_p3 = scmp.eq.s32.totalorder %s1671_s30, 0 }
  0x4c   : > { %1547 = dma.done.wait (%p2009_p3), [#allocation6], 512   ;;  %p2010_p13 = pmov %p2009_p3 }
  0x4d   : > { %v1587_v0 = vmov 0.0   ;;  %vm1588_vm0 = vmmov 0   ;;  %v1356_v1 = vld [vmem:[#allocation7 + $0x8] sm:$0xff]   ;;  %v1357_v2 = vld [vmem:[#allocation5 + $0x8] sm:$0xff]   ;;  %v1358_v3 = vld [vmem:[#allocation7] sm:$0xff]   ;;  %vm387_vm1 = vcmask 261120   ;;  %v509_v20 = vlaneseq }
  0x4e   : > { %1549 = vsyncadd (%p2010_p13), [#allocation6], 4294966784  ;;  %1243 = vmatprep.subr.bf16.mxu1 %v1587_v0  ;;  %1235 = vmatprep.subr.bf16.mxu0 %v1587_v0  ;;  %v1359_v4 = vld [vmem:[#allocation5] sm:$0xff]   ;;  %v363_v5 = vld [vmem:[%s313_s22] sm:$0xf]  ;;  %s1589_s11 = smov 104  }
  0x4f   : > { %1247 = vmatprep.mubr.msk.bf16.mxu1 %vm1588_vm0, %v1587_v0  ;;  %1239 = vmatprep.mubr.msk.bf16.mxu0 %vm1588_vm0, %v1587_v0  ;;  %v1205_v6 = vld [vmem:[%s1990_s4] ss:$0 sm:$0xff]  ;;  %s1590_s13 = smov 120   ;;  %s1591_s23 = smov 112   ;;  %v1593_v18 = vmov 1983009808  }
  0x50   : > { %1244 = vmatpush3.bf16.msra.mxu1 %v1356_v1  ;;  %1236 = vmatpush3.bf16.msra.mxu0 %v1357_v2  ;;  %v1201_v8 = vld [vmem:[%s1988_s2] ss:$0 sm:$0xff]  ;;  %s1592_s12 = smov 96   ;;  %v507_v19 = vunpack.c.l.s4 %v1593_v18  ;;  %v1594_v21 = vmov 1934713408   ;;  %v510_v24 = vshrl.u32 %v509_v20, 7 }
  0x51   : > { %1245 = vmatprep.subr.bf16.mxu1 %v1587_v0  ;;  %1237 = vmatprep.subr.bf16.mxu0 %v1587_v0  ;;  %v539_v22 = vunpack.c.l.s4 %v1594_v21  ;;  %vm644_vm2 = vcmask 60416   ;;  %s1803_s17 = sshll.u32 %s1760_s20, 4  ;;  %s964_s15 = sand.u32 1, %s1671_s30  }
  0x52   : > { %v508_v23 = vunpack.c.0.s8 %v507_v19  ;;  %s1815_s18 = sshll.u32 %s1572_s27, 8  ;;  %s354_s16 = scalar_lea.vmem [#allocation9], %s1803_s17 }
  0x53   : > { %v540_v27 = vunpack.c.0.s8 %v539_v22  ;;  %s1001_s21 = sshll.u32 %s354_s16, 4  ;;  %s1822_s27 = scalar_lea.hbm %s1992_s6, %s1815_s18  ;;  %s1824_s21 = int_to_ptr.vmem [resolvable:$true] %s1001_s21 }
  0x54   : > { %1246 = vmatpush3.bf16.msra.mxu1 %v1358_v3  ;;  %1238 = vmatpush3.bf16.msra.mxu0 %v1359_v4  ;;  %v1778_v28 = vsub.s32 %v508_v23, %v510_v24  ;;  %s1835_s3 = scalar_lea.vmem [#allocation8], %s1803_s17  ;;  %s1840_s9 = scalar_lea.sflag [#allocation10], %s964_s15 }
  0x55   : > { %v1780_v35 = vsub.s32 %v540_v27, %v510_v24  ;;  %s984_s8 = sshll.u32 %s1835_s3, 4  ;;  %s1874_s8 = int_to_ptr.vmem [resolvable:$true] %s984_s8 }
  0x57   : > { %1248 = vmatmul.mubr.msk.bf16.vlgmr.msra.gmra.mxu1 %vm387_vm1, %v363_v5  ;;  %1240 = vmatmul.mubr.msk.bf16.vlgmr.msra.gmra.mxu0 %vm387_vm1, %v363_v5 }
 0x117   : > { %v488_v7 = vpop.f32.mrf.mxu1  ;;  %v425_v10 = vpop.f32.mrf.mxu0 }
 0x118   : > { %v489_v9 = vadd.f32 %v1205_v6, %v488_v7  ;;  %v426_v12 = vadd.f32 %v1201_v8, %v425_v10 }
 0x119   : > { %v1249_v11 = vpop.f32.mrf.mxu1  ;;  %v1241_v13 = vpop.f32.mrf.mxu0 }
 0x11a   : > { %656 = vrot.lane.b32.xlu1 %v489_v9, %s1589_s11  ;;  %650 = vrot.lane.b32.xlu0 %v489_v9, %s1590_s13 }
 0x11b   : > { %v491_v14 = vpop.f32.mrf.mxu1  ;;  %v428_v15 = vpop.f32.mrf.mxu0 }
 0x11d   : > { %v1250_v16 = vpop.f32.mrf.mxu1  ;;  %v1242_v17 = vpop.f32.mrf.mxu0 }
 0x11e   : > { %653 = vrot.lane.b32.xlu0 %v489_v9, %s1591_s23  ;;  %495 = vrot.lane.b32.xlu1 %v426_v12, %s1590_s13  ;;  %s1595_s13 = smov [#allocation9]  }
 0x122   : > { %498 = vrot.lane.b32.xlu0 %v426_v12, %s1591_s23  ;;  %501 = vrot.lane.b32.xlu1 %v426_v12, %s1589_s11  ;;  %s1440_s11 = scalar_lea.vmem %s1824_s21, 256  ;;  %s1444_s23 = sshll.u32 %s1595_s13, 4  ;;  %s1445_s23 = int_to_ptr.vmem [resolvable:$false] %s1444_s23 }
 0x123   : > { %p1441_p4 = scmp.ne.s32.totalorder %s1824_s21, %s1440_s11  ;;  %p1447_p0 = scmp.lt.s32.totalorder %s1824_s21, %s1445_s23 }
 0x125   : > { %p1442_p8 = pnand %p1441_p4, %p1733_p9 }
 0x126   : > { %803 = vrot.lane.b32.xlu0 %v489_v9, %s1592_s12 }
 0x127   : > { %p1443_p11 = pneg %p1442_p8 }
 0x18c   : > { %v657_v25 = vpop.permute.xlu1 %656  ;;  %v651_v26 = vpop.permute.xlu0 %650 }
 0x18d   : > { %805 = vrot.lane.b32.xlu1 %v651_v26, %s1592_s12  ;;  %v675_v29 = vcombine.low %v651_v26, %v657_v25  ;;  %v676_v30 = vcombine.high %v651_v26, %v657_v25 }
 0x18f   : > { %v683_v36 = vrot.slane %v675_v29, %v1778_v28  ;;  %v690_v37 = vrot.slane %v676_v30, %v1778_v28 }
 0x190   : > { %v654_v31 = vpop.permute.xlu0 %653  ;;  %v496_v32 = vpop.permute.xlu1 %495 }
 0x191   : > { %v659_v33 = vcombine.low %v489_v9, %v654_v31  ;;  %v660_v34 = vcombine.high %v489_v9, %v654_v31  ;;  %807 = vrot.lane.b32.xlu0 %v654_v31, %s1592_s12  ;;  %809 = vrot.lane.b32.xlu1 %v657_v25, %s1592_s12  ;;  %s1446_s12 = scalar_lea.vmem %s1445_s23, 512 }
 0x192   : > { %p1448_p5 = scmp.lt.s32.totalorder %s1446_s12, %s1440_s11 }
 0x193   : > { %v667_v38 = vrot.slane %v659_v33, %v1778_v28  ;;  %v674_v39 = vrot.slane %v660_v34, %v1778_v28 }
 0x194   : > { %v499_v40 = vpop.permute.xlu0 %498  ;;  %v502_v41 = vpop.permute.xlu1 %501  ;;  %p1449_p10 = por %p1448_p5, %p1447_p0 }
 0x195   : > { %v691_v42 = vcombine.low %v667_v38, %v683_v36  ;;  %v692_v43 = vcombine.high %v667_v38, %v683_v36  ;;  %v707_v44 = vcombine.low %v674_v39, %v690_v37  ;;  %v708_v45 = vcombine.high %v674_v39, %v690_v37 }
 0x196   : > { %v504_v46 = vcombine.low %v426_v12, %v499_v40  ;;  %v505_v47 = vcombine.high %v426_v12, %v499_v40  ;;  %v520_v48 = vcombine.low %v496_v32, %v502_v41  ;;  %v521_v49 = vcombine.high %v496_v32, %v502_v41  ;;  %p1450_p1 = pnand %p1449_p10, %p1443_p11 }
 0x197   : > { %v699_v50 = vrot.slane %v691_v42, %v1780_v35  ;;  %v706_v51 = vrot.slane %v692_v43, %v1780_v35  ;;  %v715_v52 = vrot.slane %v707_v44, %v1780_v35  ;;  %v722_v53 = vrot.slane %v708_v45, %v1780_v35 }
 0x198   : > { %v512_v54 = vrot.slane %v504_v46, %v1778_v28  ;;  %v519_v55 = vrot.slane %v505_v47, %v1778_v28  ;;  %v528_v56 = vrot.slane %v520_v48, %v1778_v28  ;;  %v535_v57 = vrot.slane %v521_v49, %v1778_v28 }
 0x199   : > { %v727_v58 = vcombine.low %v699_v50, %v706_v51  ;;  %v1211_v59 = vcombine.high %v699_v50, %v706_v51  ;;  %v743_v60 = vcombine.low %v715_v52, %v722_v53  ;;  %v1212_v61 = vcombine.high %v715_v52, %v722_v53 }
 0x19a   : > { %v536_v62 = vcombine.low %v512_v54, %v528_v56  ;;  %v537_v63 = vcombine.high %v512_v54, %v528_v56  ;;  %v552_v0 = vcombine.low %v519_v55, %v535_v57  ;;  %v553_v1 = vcombine.high %v519_v55, %v535_v57 }
 0x19b   : > { %v734_v2 = vrot.slane %v727_v58, %v1778_v28  ;;  %v742_v3 = vrot.slane %v1211_v59, %v1778_v28  ;;  %v750_v4 = vrot.slane %v743_v60, %v1778_v28  ;;  %v758_v5 = vrot.slane %v1212_v61, %v1778_v28 }
 0x19c   : > { %v544_v6 = vrot.slane %v536_v62, %v1780_v35  ;;  %v551_v7 = vrot.slane %v537_v63, %v1780_v35  ;;  %v560_v8 = vrot.slane %v552_v0, %v1780_v35  ;;  %v567_v9 = vrot.slane %v553_v1, %v1780_v35 }
 0x19d   : > { %v759_v10 = vcombine.low %v734_v2, %v742_v3  ;;  %v760_v11 = vcombine.high %v734_v2, %v742_v3  ;;  %v775_v12 = vcombine.low %v750_v4, %v758_v5  ;;  %v776_v13 = vcombine.high %v750_v4, %v758_v5 }
 0x19e   : > { %v572_v14 = vcombine.low %v544_v6, %v551_v7  ;;  %v1209_v15 = vcombine.high %v544_v6, %v551_v7  ;;  %v588_v16 = vcombine.low %v560_v8, %v567_v9  ;;  %v1210_v17 = vcombine.high %v560_v8, %v567_v9 }
 0x19f   : > { %v767_v18 = vrot.slane %v759_v10, %v1780_v35  ;;  %v774_v19 = vrot.slane %v760_v11, %v1780_v35  ;;  %v783_v20 = vrot.slane %v775_v12, %v1780_v35  ;;  %v790_v21 = vrot.slane %v776_v13, %v1780_v35 }
 0x1a0   : > { %v579_v22 = vrot.slane %v572_v14, %v1778_v28  ;;  %v587_v23 = vrot.slane %v1209_v15, %v1778_v28  ;;  %v595_v24 = vrot.slane %v588_v16, %v1778_v28  ;;  %v603_v25 = vrot.slane %v1210_v17, %v1778_v28 }
 0x1a1   : > { %v791_v26 = vcombine.low %v767_v18, %v783_v20  ;;  %v792_v27 = vcombine.high %v767_v18, %v783_v20  ;;  %v793_v29 = vcombine.low %v774_v19, %v790_v21  ;;  %v794_v30 = vcombine.high %v774_v19, %v790_v21 }
 0x1a2   : > { %v604_v31 = vcombine.low %v579_v22, %v587_v23  ;;  %v605_v32 = vcombine.high %v579_v22, %v587_v23  ;;  %v620_v33 = vcombine.low %v595_v24, %v603_v25  ;;  %v621_v34 = vcombine.high %v595_v24, %v603_v25 }
 0x1a3   : > { %v795_v36 = vpack.c.bf16 %v791_v26, %v791_v26  ;;  %v796_v37 = vpack.c.bf16 %v792_v27, %v792_v27  ;;  %v797_v38 = vpack.c.bf16 %v793_v29, %v793_v29  ;;  %v798_v39 = vpack.c.bf16 %v794_v30, %v794_v30 }
 0x1a4   : > { %v612_v40 = vrot.slane %v604_v31, %v1780_v35  ;;  %v619_v41 = vrot.slane %v605_v32, %v1780_v35  ;;  %v628_v42 = vrot.slane %v620_v33, %v1780_v35  ;;  %v635_v43 = vrot.slane %v621_v34, %v1780_v35 }
 0x1a5   : > { %799 = vst.msk [vmem:[%s354_s16] sm:$0xf] %vm644_vm2, %v795_v36  ;;  %800 = vst.msk [vmem:[%s354_s16 + $0x4] sm:$0xf] %vm644_vm2, %v796_v37 }
 0x1a6   : > { %801 = vst.msk [vmem:[%s354_s16 + $0x8] sm:$0xf] %vm644_vm2, %v797_v38  ;;  %802 = vst.msk [vmem:[%s354_s16 + $0xc] sm:$0xf] %vm644_vm2, %v798_v39  ;;  %v636_v44 = vcombine.low %v612_v40, %v628_v42  ;;  %v637_v45 = vcombine.high %v612_v40, %v628_v42  ;;  %v638_v46 = vcombine.low %v619_v41, %v635_v43 }
 0x1a7   : > { %v639_v47 = vcombine.high %v619_v41, %v635_v43 }
 0x1a8   : > { %1453 = shalt.err (!%p1450_p1)
}
 0x1a9   : > { %s1454_s30 = scalar_lea.hbm %s1822_s27, 256  ;;  %s1458_s22 = scalar_lea.hbm %s1992_s6, 512 }
 0x1aa   : > { %p1455_p2 = scmp.ne.s32.totalorder %s1822_s27, %s1454_s30  ;;  %p1459_p12 = scmp.lt.s32.totalorder %s1822_s27, %s1992_s6 }
 0x1ab   : > { %p1460_p3 = scmp.lt.s32.totalorder %s1458_s22, %s1454_s30 }
 0x1ac   : > { %p1456_p6 = pnand %p1455_p2, %p1733_p9 }
 0x1ad   : > { %p1461_p13 = por %p1460_p3, %p1459_p12 }
 0x1ae   : > { %p1457_p7 = pneg %p1456_p6 }
 0x1b0   : > { %p1462_p4 = pnand %p1461_p13, %p1457_p7 }
 0x1b2   : > { %1465 = shalt.err (!%p1462_p4)
}
 0x1b3   : > { %s1596_s11 = smov 64   ;;  %s1597_s23 = smov 4   ;;  %v640_v48 = vpack.c.bf16 %v636_v44, %v636_v44  ;;  %v641_v49 = vpack.c.bf16 %v637_v45, %v637_v45  ;;  %v642_v50 = vpack.c.bf16 %v638_v46, %v638_v46  ;;  %v643_v51 = vpack.c.bf16 %v639_v47, %v639_v47 }
 0x1b4   : > { %1262 = dma.vmem_to_hbm [thread:$0]  (%p1733_p9), %s1824_s21, 256, %s1822_s27, %s1840_s9, %s1596_s11, %s1596_s11, %s1597_s23  }
 0x1b5   : > { %s1870_s15 = scalar_lea.hbm %s1991_s5, %s1815_s18  ;;  %645 = vst.msk [vmem:[%s1835_s3] sm:$0xf] %vm644_vm2, %v640_v48  ;;  %646 = vst.msk [vmem:[%s1835_s3 + $0x4] sm:$0xf] %vm644_vm2, %v641_v49  ;;  %s960_s21 = scalar_lea.sflag [#allocation4], %s1760_s20 }
 0x1b6   : > { %647 = vst.msk [vmem:[%s1835_s3 + $0x8] sm:$0xf] %vm644_vm2, %v642_v50  ;;  %648 = vst.msk [vmem:[%s1835_s3 + $0xc] sm:$0xf] %vm644_vm2, %v643_v51  ;;  %s1466_s27 = scalar_lea.vmem %s1874_s8, 256  ;;  %s1598_s16 = smov [#allocation8]  }
 0x1b7   : > { %p1467_p8 = scmp.ne.s32.totalorder %s1874_s8, %s1466_s27  ;;  %s1470_s22 = sshll.u32 %s1598_s16, 4  ;;  %s1471_s22 = int_to_ptr.vmem [resolvable:$false] %s1470_s22 }
 0x1b8   : > { %s1472_s1 = scalar_lea.vmem %s1471_s22, 512  ;;  %p1473_p5 = scmp.lt.s32.totalorder %s1874_s8, %s1471_s22 }
 0x1b9   : > { %p1468_p11 = pnand %p1467_p8, %p1733_p9  ;;  %p1474_p10 = scmp.lt.s32.totalorder %s1472_s1, %s1466_s27 }
 0x1bb   : > { %p1469_p0 = pneg %p1468_p11  ;;  %p1475_p1 = por %p1474_p10, %p1473_p5 }
 0x1bd   : > { %p1476_p2 = pnand %p1475_p1, %p1469_p0 }
 0x1bf   : > { %1479 = shalt.err (!%p1476_p2)
}
 0x1c0   : > { %s1480_s3 = scalar_lea.hbm %s1870_s15, 256  ;;  %s1484_s12 = scalar_lea.hbm %s1991_s5, 512 }
 0x1c1   : > { %p1481_p6 = scmp.ne.s32.totalorder %s1870_s15, %s1480_s3  ;;  %p1485_p3 = scmp.lt.s32.totalorder %s1870_s15, %s1991_s5 }
 0x1c2   : > { %p1486_p13 = scmp.lt.s32.totalorder %s1484_s12, %s1480_s3 }
 0x1c3   : > { %p1482_p7 = pnand %p1481_p6, %p1733_p9 }
 0x1c4   : > { %p1487_p4 = por %p1486_p13, %p1485_p3 }
 0x1c5   : > { %p1483_p12 = pneg %p1482_p7 }
 0x1c7   : > { %p1488_p8 = pnand %p1487_p4, %p1483_p12 }
 0x1c9   : > { %1491 = shalt.err (!%p1488_p8)
}
 0x1ca   : > { %1261 = dma.vmem_to_hbm [thread:$0]  (%p1733_p9), %s1874_s8, 256, %s1870_s15, %s960_s21, %s1596_s11, %s1596_s11, %s1597_s23   ;;  %v804_v52 = vpop.permute.xlu0 %803 }
 0x1cb   : > { %s361_s8 = scalar_lea.vmem [#allocation11], %s1803_s17  ;;  %s1929_s22 = scalar_lea.hbm %s1993_s7, %s1815_s18 }
 0x1cc   : > { %s1018_s15 = sshll.u32 %s361_s8, 4  ;;  %s1599_s18 = smov [#allocation11]   ;;  %s1931_s15 = int_to_ptr.vmem [resolvable:$true] %s1018_s15 }
 0x1cd   : > { %s1492_s17 = scalar_lea.vmem %s1931_s15, 256  ;;  %s1496_s1 = sshll.u32 %s1599_s18, 4  ;;  %s1497_s1 = int_to_ptr.vmem [resolvable:$false] %s1496_s1 }
 0x1ce   : > { %p1493_p11 = scmp.ne.s32.totalorder %s1931_s15, %s1492_s17  ;;  %s1498_s3 = scalar_lea.vmem %s1497_s1, 512 }
 0x1cf   : > { %p1499_p10 = scmp.lt.s32.totalorder %s1931_s15, %s1497_s1  ;;  %p1500_p1 = scmp.lt.s32.totalorder %s1498_s3, %s1492_s17 }
 0x1d0   : > { %p1494_p0 = pnand %p1493_p11, %p1733_p9 }
 0x1d1   : > { %p1501_p2 = por %p1500_p1, %p1499_p10 }
 0x1d2   : > { %p1495_p5 = pneg %p1494_p0 }
 0x1d4   : > { %p1502_p6 = pnand %p1501_p2, %p1495_p5 }
 0x1ff   : > { %v806_v53 = vpop.permute.xlu1 %805 }
 0x203   : > { %v808_v54 = vpop.permute.xlu0 %807  ;;  %v810_v55 = vpop.permute.xlu1 %809 }
 0x204   : > { %v815_v56 = vcombine.low %v804_v52, %v808_v54  ;;  %v816_v57 = vcombine.high %v804_v52, %v808_v54  ;;  %v831_v58 = vcombine.low %v806_v53, %v810_v55  ;;  %v832_v59 = vcombine.high %v806_v53, %v810_v55 }
 0x206   : > { %v823_v60 = vrot.slane %v815_v56, %v1778_v28  ;;  %v830_v61 = vrot.slane %v816_v57, %v1778_v28  ;;  %v839_v62 = vrot.slane %v831_v58, %v1778_v28  ;;  %v846_v63 = vrot.slane %v832_v59, %v1778_v28 }
 0x208   : > { %v847_v0 = vcombine.low %v823_v60, %v839_v62  ;;  %v848_v1 = vcombine.high %v823_v60, %v839_v62  ;;  %v863_v2 = vcombine.low %v830_v61, %v846_v63  ;;  %v864_v3 = vcombine.high %v830_v61, %v846_v63 }
 0x20a   : > { %v855_v4 = vrot.slane %v847_v0, %v1780_v35  ;;  %v862_v5 = vrot.slane %v848_v1, %v1780_v35  ;;  %v871_v6 = vrot.slane %v863_v2, %v1780_v35  ;;  %v878_v7 = vrot.slane %v864_v3, %v1780_v35 }
 0x20c   : > { %v883_v8 = vcombine.low %v855_v4, %v862_v5  ;;  %v1213_v9 = vcombine.high %v855_v4, %v862_v5  ;;  %v899_v10 = vcombine.low %v871_v6, %v878_v7  ;;  %v1214_v11 = vcombine.high %v871_v6, %v878_v7 }
 0x20e   : > { %v890_v12 = vrot.slane %v883_v8, %v1778_v28  ;;  %v898_v13 = vrot.slane %v1213_v9, %v1778_v28  ;;  %v906_v14 = vrot.slane %v899_v10, %v1778_v28  ;;  %v914_v15 = vrot.slane %v1214_v11, %v1778_v28 }
 0x210   : > { %v915_v16 = vcombine.low %v890_v12, %v898_v13  ;;  %v916_v17 = vcombine.high %v890_v12, %v898_v13  ;;  %v931_v18 = vcombine.low %v906_v14, %v914_v15  ;;  %v932_v19 = vcombine.high %v906_v14, %v914_v15 }
 0x212   : > { %v923_v20 = vrot.slane %v915_v16, %v1780_v35  ;;  %v930_v21 = vrot.slane %v916_v17, %v1780_v35  ;;  %v939_v22 = vrot.slane %v931_v18, %v1780_v35  ;;  %v946_v23 = vrot.slane %v932_v19, %v1780_v35 }
 0x214   : > { %v947_v24 = vcombine.low %v923_v20, %v939_v22  ;;  %v948_v25 = vcombine.high %v923_v20, %v939_v22  ;;  %v949_v26 = vcombine.low %v930_v21, %v946_v23  ;;  %v950_v28 = vcombine.high %v930_v21, %v946_v23 }
 0x216   : > { %v951_v27 = vpack.c.bf16 %v947_v24, %v947_v24  ;;  %v952_v29 = vpack.c.bf16 %v948_v25, %v948_v25  ;;  %v953_v30 = vpack.c.bf16 %v949_v26, %v949_v26  ;;  %v954_v31 = vpack.c.bf16 %v950_v28, %v950_v28 }
 0x218   : > { %955 = vst.msk [vmem:[%s361_s8] sm:$0xf] %vm644_vm2, %v951_v27  ;;  %956 = vst.msk [vmem:[%s361_s8 + $0x4] sm:$0xf] %vm644_vm2, %v952_v29 }
 0x219   : > { %957 = vst.msk [vmem:[%s361_s8 + $0x8] sm:$0xf] %vm644_vm2, %v953_v30  ;;  %958 = vst.msk [vmem:[%s361_s8 + $0xc] sm:$0xf] %vm644_vm2, %v954_v31 }
 0x21a   : > { %1505 = shalt.err (!%p1502_p6)
}
 0x21b   : > { %s1506_s20 = scalar_lea.hbm %s1929_s22, 256  ;;  %s1510_s30 = scalar_lea.hbm %s1993_s7, 512 }
 0x21c   : > { %p1507_p7 = scmp.ne.s32.totalorder %s1929_s22, %s1506_s20  ;;  %p1511_p13 = scmp.lt.s32.totalorder %s1929_s22, %s1993_s7 }
 0x21d   : > { %p1512_p4 = scmp.lt.s32.totalorder %s1510_s30, %s1506_s20 }
 0x21e   : > { %p1508_p12 = pnand %p1507_p7, %p1733_p9 }
 0x21f   : > { %p1513_p8 = por %p1512_p4, %p1511_p13 }
 0x220   : > { %p1509_p3 = pneg %p1508_p12 }
 0x222   : > { %p1514_p11 = pnand %p1513_p8, %p1509_p3 }
 0x224   : > { %1517 = shalt.err (!%p1514_p11)
}
 0x225   : > { %1263 = dma.vmem_to_hbm [thread:$0]  (%p1733_p9), %s1931_s15, 256, %s1929_s22, %s1840_s9, %s1596_s11, %s1596_s11, %s1597_s23  }
 0x226 PF: > { %s1033_s21 = sand.u32 1, %s1560_s24   ;;  %p2011_p0 = scmp.ne.s32.totalorder %s2000_s10, 0 }
 0x227   : > { %p2012_p5 = scmp.ge.s32.totalorder %s1580_s29, 2  ;;  %s1034_s27 = scalar_lea.sflag [#allocation4], %s1033_s21 }
 0x229   : > { %p1279_p10 = pnand %p2012_p5, %p2011_p0 }
 0x22b   : > { %p1280_p1 = pneg %p1279_p10 }
 0x22d   : > { %1551 = dma.done.wait (%p1280_p1), %s1034_s27, 256  }
 0x22e   : > { %1553 = vsyncadd (%p1280_p1), %s1034_s27, 4294967040  ;;  %s2013_s14 = sadd.s32 4294967294, %s1580_s29  }
 0x22f   : > { %s1042_s17 = sand.u32 1, %s2013_s14  }
 0x230   : > { %s1043_s18 = scalar_lea.sflag [#allocation10], %s1042_s17 }
 0x231   : > { %1555 = dma.done.wait (%p1280_p1), %s1043_s18, 512  }
 0x232   : > { %1557 = vsyncadd (%p1280_p1), %s1043_s18, 4294966784  ;;  %s28_s29 = sadd.s32 1, %s1580_s29   ;;  %s2014_s10 = sld [smem:[#allocation16_spill]] }
 0x233   : > { %p25_p9 = scmp.ge.s32.totalorder %s28_s29, 4   ;;  %s2015_s24 = smov %s1564_s25 }
 0x234   : > { %s2016_s25 = smov %s1568_s26  ;;  %s2017_s26 = smov %s1742_s19 }
 0x235   : > { %s2018_s27 = smov %s1576_s28  ;;  %27 = sbr.rel (!%p25_p9) target bundleno = 12 (0xc), region = 125 }
 0x238   : > { %s2019_s28 = smov %s2014_s10 }
 0x23a   :  { %1057 = vsyncpa [#allocation3], 1 }
 0x23b   :  { %1059 = vsyncpa [#allocation3 + $0x1], 1 }
 0x23c   :  { %1060 = vsyncpa [#allocation6], 1 }
 0x23d   :  { %1061 = vsyncpa [#allocation4], 1 }
 0x23e   :  { %1063 = vsyncpa [#allocation4 + $0x1], 1 }
 0x23f   :  { %1064 = vsyncpa [#allocation10], 1 }
 0x240   :  { %1066 = vsyncpa [#allocation10 + $0x1], 1 }

</bundles_post_ra>
